<compile_context>
chip_gen: v7x
topology: tpu7x:2x2x1
jax: 0.10.0
libtpu: 0.0.40
codegen_flags: <defaults>
</compile_context>

<pallas_src>
import math

import jax
import jax.numpy as jnp
from jax.experimental import pallas as pl
from jax.experimental.pallas import tpu as pltpu


# ---------------------------------------------------------------------------
# Helpers
# ---------------------------------------------------------------------------
def _round_up(x, m):
    return ((x + m - 1) // m) * m


def _pick_hw_tile(hwp, max_tile):
    """Largest multiple of 128 dividing hwp (hwp itself a multiple of 128)."""
    t = max((min(max_tile, hwp) // 128) * 128, 128)
    while hwp % t != 0:
        t -= 128
    return t


def _vmem_capacity_bytes():
    try:
        info = pltpu.get_tpu_info()
        return int(getattr(info, "vmem_capacity_bytes", 64 * 1024 * 1024))
    except Exception:
        return 64 * 1024 * 1024  # v7x-safe default


# ---------------------------------------------------------------------------
# Fused single-pass kernel: grid = (B, phase, hw_tile).
#   phase 0: read high/low tile, compute la, cache both in VMEM slabs,
#            accumulate per-channel pool sums; finalize pooled logit diff.
#   phase 1: read cached slabs only, emit out + packed attention.
# ---------------------------------------------------------------------------
def _pafm_fused_kernel(high_ref, low_ref, w_ref, bias_ref, wdh_ref, wdl_ref,
                       wdhc_ref, wdlc_ref, bd_ref, out_ref, attn_ref,
                       high_slab, la_slab, sumh_ref, suml_ref, pool_ref):
    p = pl.program_id(1)
    t = pl.program_id(2)
    nt = pl.num_programs(2)
    tile = out_ref.shape[-1]
    off = pl.multiple_of(t * tile, 128)

    @pl.when(p == 0)
    def _phase0():
        @pl.when(t == 0)
        def _init():
            sumh_ref[...] = jnp.zeros_like(sumh_ref)
            suml_ref[...] = jnp.zeros_like(suml_ref)

        high = high_ref[0].astype(jnp.float32)                     # (Ch, T)
        low = low_ref[0].astype(jnp.float32)                       # (Cl, T)

        # conv_adp (BN scale folded into w_ref) + BN bias + ReLU
        la = jnp.dot(w_ref[...], low, preferred_element_type=jnp.float32)
        la = jnp.maximum(la + bias_ref[...], 0.0)                  # (Ch, T)

        # cache for phase 1 (HBM read happens exactly once per pixel)
        high_slab[:, pl.ds(off, tile)] = high
        la_slab[:, pl.ds(off, tile)] = la

        # per-channel running sums for the global average pool
        sumh_ref[...] += jnp.sum(high, axis=1, keepdims=True)      # (Ch, 1)
        suml_ref[...] += jnp.sum(la, axis=1, keepdims=True)        # (Ch, 1)

        @pl.when(t == nt - 1)
        def _finalize_pool():
            # wd columns are pre-scaled by 1/HW; bd_ref carries the padding
            # correction, so this is exactly wd_h·mean(high)+wd_l·mean(la)+bd.
            ps = jnp.sum(wdhc_ref[...] * sumh_ref[...]
                         + wdlc_ref[...] * suml_ref[...],
                         axis=0, keepdims=True)                    # (1, 1)
            pool_ref[...] = ps + bd_ref[...]

    @pl.when(p == 1)
    def _phase1():
        high = high_slab[:, pl.ds(off, tile)]                      # (Ch, T) f32
        la = la_slab[:, pl.ds(off, tile)]                          # (Ch, T) f32
        d = (jnp.dot(wdh_ref[...], high, preferred_element_type=jnp.float32)
             + jnp.dot(wdl_ref[...], la, preferred_element_type=jnp.float32)
             + pool_ref[...])                                      # (1, T)
        a0 = jax.nn.sigmoid(d)                                     # softmax[0]
        a1 = 1.0 - a0                                              # softmax[1]
        out_ref[0] = (a0 * high + a1 * la).astype(out_ref.dtype)
        attn_ref[0, 0:1, :] = a0.astype(attn_ref.dtype)
        attn_ref[0, 1:2, :] = a1.astype(attn_ref.dtype)


def _pafm_fused_call(high, low, w_adp, bias_col, wdh_row, wdl_row,
                     wdh_col_s, wdl_col_s, bd_adj, *, B, Ch, Cl, HWp, T, nt,
                     out_dtype, vmem_cap, fused_est):
    vmem_limit = min(int(0.9 * vmem_cap),
                     max(32 * 1024 * 1024, fused_est + (8 << 20)))
    return pl.pallas_call(
        _pafm_fused_kernel,
        out_shape=(jax.ShapeDtypeStruct((B, Ch, HWp), out_dtype),
                   jax.ShapeDtypeStruct((B, 2, HWp), out_dtype)),
        grid_spec=pltpu.PrefetchScalarGridSpec(
            num_scalar_prefetch=0,
            grid=(B, 2, nt),
            in_specs=[
                # during phase 1 the block index is pinned to 0 -> no re-DMA
                pl.BlockSpec((1, Ch, T), lambda b, p, t: (b, 0, t * (1 - p))),
                pl.BlockSpec((1, Cl, T), lambda b, p, t: (b, 0, t * (1 - p))),
                pl.BlockSpec((Ch, Cl), lambda b, p, t: (0, 0)),   # w_adp (BN-folded)
                pl.BlockSpec((Ch, 1), lambda b, p, t: (0, 0)),    # bn bias
                pl.BlockSpec((1, Ch), lambda b, p, t: (0, 0)),    # wd_h row
                pl.BlockSpec((1, Ch), lambda b, p, t: (0, 0)),    # wd_l row
                pl.BlockSpec((Ch, 1), lambda b, p, t: (0, 0)),    # wd_h col / HW
                pl.BlockSpec((Ch, 1), lambda b, p, t: (0, 0)),    # wd_l col / HW
                pl.BlockSpec((1, 1), lambda b, p, t: (0, 0)),     # bd (pad-corrected)
            ],
            out_specs=[
                # phase 0 keeps the index constant -> no writeback until phase 1
                pl.BlockSpec((1, Ch, T), lambda b, p, t: (b, 0, t * p)),   # out
                pl.BlockSpec((1, 2, T), lambda b, p, t: (b, 0, t * p)),    # attn packed
            ],
            scratch_shapes=[
                pltpu.VMEM((Ch, HWp), jnp.float32),   # cached high
                pltpu.VMEM((Ch, HWp), jnp.float32),   # cached la
                pltpu.VMEM((Ch, 1), jnp.float32),     # sum(high)
                pltpu.VMEM((Ch, 1), jnp.float32),     # sum(la)
                pltpu.VMEM((1, 1), jnp.float32),      # pooled logit diff
            ]),
        compiler_params=pltpu.CompilerParams(
            dimension_semantics=("parallel", "arbitrary", "arbitrary"),
            vmem_limit_bytes=vmem_limit),
    )(high, low, w_adp, bias_col, wdh_row, wdl_row, wdh_col_s, wdl_col_s, bd_adj)


# ---------------------------------------------------------------------------
# Two-pass fallback (when the per-image VMEM slab does not fit).
# ---------------------------------------------------------------------------
def _pafm_pool_kernel(high_ref, low_ref, w_ref, bias_ref, sumh_ref, suml_ref):
    @pl.when(pl.program_id(1) == 0)
    def _init():
        sumh_ref[...] = jnp.zeros_like(sumh_ref)
        suml_ref[...] = jnp.zeros_like(suml_ref)

    high = high_ref[0].astype(jnp.float32)                         # (Ch, T)
    low = low_ref[0].astype(jnp.float32)                           # (Cl, T)
    la = jnp.dot(w_ref[...], low, preferred_element_type=jnp.float32)
    la = jnp.maximum(la + bias_ref[...], 0.0)                      # (Ch, T)
    sumh_ref[0] += jnp.sum(high, axis=1, keepdims=True)
    suml_ref[0] += jnp.sum(la, axis=1, keepdims=True)


def _pafm_main_kernel(pool_ref, high_ref, low_ref, w_ref, bias_ref,
                      wdh_ref, wdl_ref, out_ref, attn_ref):
    high = high_ref[0].astype(jnp.float32)                         # (Ch, T)
    low = low_ref[0].astype(jnp.float32)                           # (Cl, T)
    la = jnp.dot(w_ref[...], low, preferred_element_type=jnp.float32)
    la = jnp.maximum(la + bias_ref[...], 0.0)
    d = (jnp.dot(wdh_ref[...], high, preferred_element_type=jnp.float32)
         + jnp.dot(wdl_ref[...], la, preferred_element_type=jnp.float32)
         + pool_ref[0])                                            # (1, T)
    a0 = jax.nn.sigmoid(d)
    a1 = 1.0 - a0
    out_ref[0] = (a0 * high + a1 * la).astype(out_ref.dtype)
    attn_ref[0, 0:1, :] = a0.astype(attn_ref.dtype)
    attn_ref[0, 1:2, :] = a1.astype(attn_ref.dtype)


def _pafm_two_pass_call(high, low, w_adp, bias_col, wdh_row, wdl_row,
                        wd_h, wd_l, relu_bias, bd, n_pad, HW, *,
                        B, Ch, Cl, HWp, T, nt, out_dtype):
    vmem_limit = 32 * 1024 * 1024

    sum_h, sum_l = pl.pallas_call(
        _pafm_pool_kernel,
        out_shape=(jax.ShapeDtypeStruct((B, Ch, 1), jnp.float32),
                   jax.ShapeDtypeStruct((B, Ch, 1), jnp.float32)),
        grid_spec=pltpu.PrefetchScalarGridSpec(
            num_scalar_prefetch=0,
            grid=(B, nt),
            in_specs=[
                pl.BlockSpec((1, Ch, T), lambda b, t: (b, 0, t)),
                pl.BlockSpec((1, Cl, T), lambda b, t: (b, 0, t)),
                pl.BlockSpec((Ch, Cl), lambda b, t: (0, 0)),
                pl.BlockSpec((Ch, 1), lambda b, t: (0, 0)),
            ],
            out_specs=[
                pl.BlockSpec((1, Ch, 1), lambda b, t: (b, 0, 0)),
                pl.BlockSpec((1, Ch, 1), lambda b, t: (b, 0, 0)),
            ]),
        compiler_params=pltpu.CompilerParams(
            dimension_semantics=("parallel", "arbitrary"),
            vmem_limit_bytes=vmem_limit),
    )(high, low, w_adp, bias_col)

    # Tiny contraction in the wrapper (exact padding correction for la).
    inv_hw = 1.0 / HW
    mean_h = sum_h[:, :, 0] * inv_hw                                   # (B, Ch)
    mean_l = (sum_l[:, :, 0] - n_pad * relu_bias[None, :]) * inv_hw    # (B, Ch)
    pool_bias = (mean_h @ wd_h + mean_l @ wd_l + bd).astype(jnp.float32)
    pool_bias = pool_bias.reshape(B, 1, 1)

    out, attn = pl.pallas_call(
        _pafm_main_kernel,
        out_shape=(jax.ShapeDtypeStruct((B, Ch, HWp), out_dtype),
                   jax.ShapeDtypeStruct((B, 2, HWp), out_dtype)),
        grid_spec=pltpu.PrefetchScalarGridSpec(
            num_scalar_prefetch=0,
            grid=(B, nt),
            in_specs=[
                pl.BlockSpec((1, 1, 1), lambda b, t: (b, 0, 0)),     # pooled bias
                pl.BlockSpec((1, Ch, T), lambda b, t: (b, 0, t)),
                pl.BlockSpec((1, Cl, T), lambda b, t: (b, 0, t)),
                pl.BlockSpec((Ch, Cl), lambda b, t: (0, 0)),
                pl.BlockSpec((Ch, 1), lambda b, t: (0, 0)),
                pl.BlockSpec((1, Ch), lambda b, t: (0, 0)),
                pl.BlockSpec((1, Ch), lambda b, t: (0, 0)),
            ],
            out_specs=[
                pl.BlockSpec((1, Ch, T), lambda b, t: (b, 0, t)),    # out
                pl.BlockSpec((1, 2, T), lambda b, t: (b, 0, t)),     # attn packed
            ]),
        compiler_params=pltpu.CompilerParams(
            dimension_semantics=("parallel", "parallel"),
            vmem_limit_bytes=vmem_limit),
    )(pool_bias, high, low, w_adp, bias_col, wdh_row, wdl_row)
    return out, attn


# ---------------------------------------------------------------------------
# Wrapper
# ---------------------------------------------------------------------------
def pafm_forward(high_nchw, low_nchw, params, *, max_tile=8192,
                 out_dtype=jnp.float32, force_two_pass=False):
    """high: (B, h_cls, H, W)  low: (B, l_cls, H, W) -> (out, attn0, attn1).

    Inputs are streamed in their given dtype (pass bf16 for ~2x HBM savings);
    all arithmetic is f32.  out_dtype controls the output storage dtype.
    """
    B, Ch, H, W = high_nchw.shape
    _, Cl, _, _ = low_nchw.shape
    HW = H * W
    HWp = _round_up(HW, 128)
    n_pad = HWp - HW

    # Free reshapes: NCHW -> (B, C, HW); pad HW to a multiple of 128 if needed
    # so the lane axis stays tileable (padding corrected exactly below).
    high = high_nchw.reshape(B, Ch, HW)
    low = low_nchw.reshape(B, Cl, HW)
    if n_pad:
        high = jnp.pad(high, ((0, 0), (0, 0), (0, n_pad)))
        low = jnp.pad(low, ((0, 0), (0, 0), (0, n_pad)))

    f32 = jnp.float32
    # Fold BN scale into the 1x1 conv weight; keep the BN bias as (Ch, 1).
    w_adp_f = (params["bn_scale"][:, None] * params["w_adp"]).astype(f32)   # (Ch, Cl)
    bias_col = params["bn_bias"][:, None].astype(f32)                       # (Ch, 1)
    relu_bias = jnp.maximum(params["bn_bias"], 0.0).astype(f32)             # (Ch,)

    # 2-class softmax -> sigmoid of logit difference.
    w2 = params["w2"].astype(f32)                                           # (2, 2Ch)
    wd = w2[0] - w2[1]
    wd_h, wd_l = wd[:Ch], wd[Ch:]
    wdh_row = wd_h.reshape(1, Ch)
    wdl_row = wd_l.reshape(1, Ch)
    bd = (params["b2"][0] - params["b2"][1]).astype(f32)
    # Padded pixels contribute 0 to sum(high) and relu(bn_bias) to sum(la);
    # fold the exact correction into the pooled-logit constant.
    bd_adj = bd - (n_pad / HW) * jnp.dot(wd_l, relu_bias)

    T = _pick_hw_tile(HWp, max_tile)
    nt = HWp // T

    # VMEM gate for the fused (read-once) path; re-derived per generation.
    in_bytes = jnp.dtype(high.dtype).itemsize
    out_bytes = jnp.dtype(out_dtype).itemsize
    ch8, cl8 = _round_up(Ch, 8), _round_up(Cl, 8)
    vmem_cap = _vmem_capacity_bytes()
    fused_est = (2 * ch8 * HWp * 4                      # high / la slabs (f32)
                 + 4 * (ch8 + cl8) * T * in_bytes       # double-buffered inputs
                 + 4 * (ch8 + 8) * T * out_bytes        # double-buffered outputs
                 + (2 << 20))                           # weights / scratch margin
    use_fused = (not force_two_pass) and fused_est <= vmem_cap // 2

    if use_fused:
        out, attn = _pafm_fused_call(
            high, low, w_adp_f, bias_col, wdh_row, wdl_row,
            (wd_h[:, None] / HW).astype(f32), (wd_l[:, None] / HW).astype(f32),
            bd_adj.reshape(1, 1), B=B, Ch=Ch, Cl=Cl, HWp=HWp, T=T, nt=nt,
            out_dtype=out_dtype, vmem_cap=vmem_cap, fused_est=fused_est)
    else:
        out, attn = _pafm_two_pass_call(
            high, low, w_adp_f, bias_col, wdh_row, wdl_row, wd_h, wd_l,
            relu_bias, bd, n_pad, HW, B=B, Ch=Ch, Cl=Cl, HWp=HWp, T=T, nt=nt,
            out_dtype=out_dtype)

    out = out[:, :, :HW].reshape(B, Ch, H, W)
    attn = attn[:, :, :HW].reshape(B, 2, H, W)
    return out, attn[:, 0:1], attn[:, 1:2]


# ---------------------------------------------------------------------------
# Parameters (deterministic, matching PAFM.init()) and a pure-JAX reference.
# ---------------------------------------------------------------------------
def make_params(key, h_cls, l_cls):
    k1, k2, k3 = jax.random.split(key, 3)
    std_adp = math.sqrt(2.0 / h_cls)
    w_adp = std_adp * jax.random.normal(k1, (h_cls, l_cls), jnp.float32)

    eps = 1e-5
    gamma = jnp.ones((h_cls,), jnp.float32)
    beta = jnp.zeros((h_cls,), jnp.float32)
    run_mean = jnp.zeros((h_cls,), jnp.float32)
    run_var = jnp.ones((h_cls,), jnp.float32)
    bn_scale = gamma / jnp.sqrt(run_var + eps)
    bn_bias = beta - run_mean * bn_scale

    std2 = math.sqrt(2.0 / 2.0)
    w2 = std2 * jax.random.normal(k2, (2, 2 * h_cls), jnp.float32)
    bound = 1.0 / math.sqrt(2 * h_cls)
    b2 = jax.random.uniform(k3, (2,), jnp.float32, -bound, bound)
    return {"w_adp": w_adp, "bn_scale": bn_scale, "bn_bias": bn_bias,
            "w2": w2, "b2": b2}


def pafm_reference(high, low, params):
    """Pure-JAX reference in the original (concat + avgpool + softmax) form."""
    B, Ch, H, W = high.shape
    high = high.astype(jnp.float32)
    low = low.astype(jnp.float32)
    la = jnp.einsum("oc,bchw->bohw", params["w_adp"], low)
    la = la * params["bn_scale"].reshape(1, Ch, 1, 1) + params["bn_bias"].reshape(1, Ch, 1, 1)
    la = jnp.maximum(la, 0.0)
    cat = jnp.concatenate([high, la], axis=1)
    pooled = jnp.mean(cat, axis=(2, 3), keepdims=True)
    pcat = pooled + cat
    logits = jnp.einsum("oc,bchw->bohw", params["w2"], pcat) + params["b2"].reshape(1, 2, 1, 1)
    attn = jax.nn.softmax(logits, axis=1)
    a0 = attn[:, 0:1]
    a1 = attn[:, 1:2]
    out = a0 * high + a1 * la
    return out, a0, a1


if __name__ == "__main__":
    B, h_cls, l_cls = 2, 4, 8
    key = jax.random.PRNGKey(0)
    params = make_params(jax.random.fold_in(key, 7), h_cls, l_cls)

    def run_case(seed, H, W, *, in_dtype, out_dtype, force_two_pass, max_tile,
                 atol, rtol):
        kh, kl = jax.random.split(jax.random.fold_in(key, seed), 2)
        high = jax.random.normal(kh, (B, h_cls, H, W), jnp.float32).astype(in_dtype)
        low = jax.random.normal(kl, (B, l_cls, H, W), jnp.float32).astype(in_dtype)
        out, a0, a1 = pafm_forward(high, low, params, max_tile=max_tile,
                                   out_dtype=out_dtype,
                                   force_two_pass=force_two_pass)
        jax.block_until_ready((out, a0, a1))
        r_out, r_a0, r_a1 = pafm_reference(high, low, params)
        for name, got, want in (("out", out, r_out), ("a0", a0, r_a0),
                                ("a1", a1, r_a1)):
            g = got.astype(jnp.float32)
            ok = bool(jnp.allclose(g, want, atol=atol, rtol=rtol))
            assert ok, (seed, name, float(jnp.max(jnp.abs(g - want))))

    # Fused (read-once) path, bf16 streaming, multi-tile HW, f32 outputs.
    run_case(1, 16, 16, in_dtype=jnp.bfloat16, out_dtype=jnp.float32,
             force_two_pass=False, max_tile=128, atol=1e-4, rtol=1e-3)
    # Two-pass fallback path, f32 inputs/outputs.
    run_case(2, 16, 16, in_dtype=jnp.float32, out_dtype=jnp.float32,
             force_two_pass=True, max_tile=128, atol=1e-4, rtol=1e-3)
    # Fused path with HW padding (144 -> 256) and bf16 outputs.
    run_case(3, 12, 12, in_dtype=jnp.bfloat16, out_dtype=jnp.bfloat16,
             force_two_pass=False, max_tile=8192, atol=5e-2, rtol=2e-2)

    # TODO(synk): BatchNorm is applied in inference form (folded running stats);
    # training-mode batch statistics are not implemented.
    print("KERNEL_OK")
</pallas_src>

<mosaic_0001>
module attributes {stable_mosaic.version = 11 : i64} {
  func.func @_pafm_fused_kernel(%arg0: i32, %arg1: i32, %arg2: i32, %arg3: memref<1x4x128xbf16, #tpu.memory_space<vmem>>, %arg4: memref<1x8x128xbf16, #tpu.memory_space<vmem>>, %arg5: memref<4x8xf32, #tpu.memory_space<vmem>>, %arg6: memref<4x1xf32, #tpu.memory_space<vmem>>, %arg7: memref<1x4xf32, #tpu.memory_space<vmem>>, %arg8: memref<1x4xf32, #tpu.memory_space<vmem>>, %arg9: memref<4x1xf32, #tpu.memory_space<vmem>>, %arg10: memref<4x1xf32, #tpu.memory_space<vmem>>, %arg11: memref<1x1xf32, #tpu.memory_space<vmem>>, %arg12: memref<1x4x128xf32, #tpu.memory_space<vmem>>, %arg13: memref<1x2x128xf32, #tpu.memory_space<vmem>>, %arg14: memref<4x256xf32, #tpu.memory_space<vmem>>, %arg15: memref<4x256xf32, #tpu.memory_space<vmem>>, %arg16: memref<4x1xf32, #tpu.memory_space<vmem>>, %arg17: memref<4x1xf32, #tpu.memory_space<vmem>>, %arg18: memref<1x1xf32, #tpu.memory_space<vmem>>) attributes {dimension_semantics = [#tpu.dimension_semantics<parallel>, #tpu.dimension_semantics<arbitrary>, #tpu.dimension_semantics<arbitrary>], iteration_bounds = array<i64: 2, 2, 2>, scalar_prefetch = 0 : i64, scratch_operands = 5 : i64, tpu.core_type = #tpu.core_type<tc>, window_params = [{transform_indices = @transform_0, window_bounds = array<i64: 1, 4, 128>}, {transform_indices = @transform_1, window_bounds = array<i64: 1, 8, 128>}, {pipeline_mode = #tpu.pipeline_mode<synchronous>, transform_indices = @transform_2, window_bounds = array<i64: 4, 8>}, {pipeline_mode = #tpu.pipeline_mode<synchronous>, transform_indices = @transform_3, window_bounds = array<i64: 4, 1>}, {pipeline_mode = #tpu.pipeline_mode<synchronous>, transform_indices = @transform_4, window_bounds = array<i64: 1, 4>}, {pipeline_mode = #tpu.pipeline_mode<synchronous>, transform_indices = @transform_5, window_bounds = array<i64: 1, 4>}, {pipeline_mode = #tpu.pipeline_mode<synchronous>, transform_indices = @transform_6, window_bounds = array<i64: 4, 1>}, {pipeline_mode = #tpu.pipeline_mode<synchronous>, transform_indices = @transform_7, window_bounds = array<i64: 4, 1>}, {pipeline_mode = #tpu.pipeline_mode<synchronous>, transform_indices = @transform_8, window_bounds = array<i64: 1, 1>}, {transform_indices = @transform_9, window_bounds = array<i64: 1, 4, 128>}, {transform_indices = @transform_10, window_bounds = array<i64: 1, 2, 128>}]} {
    %c128_i32 = arith.constant 128 : i32
    %0 = arith.muli %arg2, %c128_i32 : i32
    %1 = tpu.assume_multiple %0, 128 : i32
    %c0_i32 = arith.constant 0 : i32
    %2 = arith.cmpi eq, %arg1, %c0_i32 : i32
    %3 = arith.extui %2 : i1 to i32
    %c0_i32_0 = arith.constant 0 : i32
    %4 = arith.cmpi ne, %3, %c0_i32_0 : i32
    scf.if %4 {
      %c0_i32_2 = arith.constant 0 : i32
      %8 = arith.cmpi eq, %arg2, %c0_i32_2 : i32
      %9 = arith.extui %8 : i1 to i32
      %c0_i32_3 = arith.constant 0 : i32
      %10 = arith.cmpi ne, %9, %c0_i32_3 : i32
      scf.if %10 {
        %cst_28 = arith.constant 0.000000e+00 : f32
        %41 = vector.broadcast %cst_28 : f32 to vector<4x1xf32>
        %c0_29 = arith.constant 0 : index
        %c0_30 = arith.constant 0 : index
        %42 = vector.load %arg16[%c0_29, %c0_30] : memref<4x1xf32, #tpu.memory_space<vmem>>, vector<4x1xf32>
        tpu.vector_store %arg16[%c0_29, %c0_30], %41 {strides = array<i32>} : memref<4x1xf32, #tpu.memory_space<vmem>>, vector<4x1xf32>,
        %cst_31 = arith.constant 0.000000e+00 : f32
        %43 = vector.broadcast %cst_31 : f32 to vector<4x1xf32>
        %c0_32 = arith.constant 0 : index
        %c0_33 = arith.constant 0 : index
        %44 = vector.load %arg17[%c0_32, %c0_33] : memref<4x1xf32, #tpu.memory_space<vmem>>, vector<4x1xf32>
        tpu.vector_store %arg17[%c0_32, %c0_33], %43 {strides = array<i32>} : memref<4x1xf32, #tpu.memory_space<vmem>>, vector<4x1xf32>,
      } else {
      }
      %c0 = arith.constant 0 : index
      %c0_4 = arith.constant 0 : index
      %c0_5 = arith.constant 0 : index
      %11 = vector.load %arg3[%c0, %c0_4, %c0_5] : memref<1x4x128xbf16, #tpu.memory_space<vmem>>, vector<1x4x128xbf16>
      %12 = vector.shape_cast %11 : vector<1x4x128xbf16> to vector<4x128xbf16>
      %13 = arith.extf %12 : vector<4x128xbf16> to vector<4x128xf32>
      %c0_6 = arith.constant 0 : index
      %c0_7 = arith.constant 0 : index
      %c0_8 = arith.constant 0 : index
      %14 = vector.load %arg4[%c0_6, %c0_7, %c0_8] : memref<1x8x128xbf16, #tpu.memory_space<vmem>>, vector<1x8x128xbf16>
      %15 = vector.shape_cast %14 : vector<1x8x128xbf16> to vector<8x128xbf16>
      %16 = arith.extf %15 : vector<8x128xbf16> to vector<8x128xf32>
      %c0_9 = arith.constant 0 : index
      %c0_10 = arith.constant 0 : index
      %17 = vector.load %arg5[%c0_9, %c0_10] : memref<4x8xf32, #tpu.memory_space<vmem>>, vector<4x8xf32>
      %cst = arith.constant dense<0.000000e+00> : vector<4x128xf32>
      %18 = tpu.matmul %17, %16, %cst {dimension_numbers = #tpu.dot_dimension_numbers<[1], [0], [0], [1], [0, 0, 1, 1], [], []>} : vector<4x8xf32>, vector<8x128xf32>, vector<4x128xf32> -> vector<4x128xf32>
      %c0_11 = arith.constant 0 : index
      %c0_12 = arith.constant 0 : index
      %19 = vector.load %arg6[%c0_11, %c0_12] : memref<4x1xf32, #tpu.memory_space<vmem>>, vector<4x1xf32>
      %20 = vector.broadcast %19 : vector<4x1xf32> to vector<4x128xf32>
      %21 = arith.addf %18, %20 : vector<4x128xf32>
      %cst_13 = arith.constant 0.000000e+00 : f32
      %22 = vector.broadcast %cst_13 : f32 to vector<4x128xf32>
      %23 = arith.maximumf %21, %22 : vector<4x128xf32>
      %c0_14 = arith.constant 0 : index
      %24 = arith.index_cast %1 : i32 to index
      %25 = vector.load %arg14[%c0_14, %24] : memref<4x256xf32, #tpu.memory_space<vmem>>, vector<4x128xf32>
      tpu.vector_store %arg14[%c0_14, %24], %13 {strides = array<i32>} : memref<4x256xf32, #tpu.memory_space<vmem>>, vector<4x128xf32>,
      %c0_15 = arith.constant 0 : index
      %26 = arith.index_cast %1 : i32 to index
      %27 = vector.load %arg15[%c0_15, %26] : memref<4x256xf32, #tpu.memory_space<vmem>>, vector<4x128xf32>
      tpu.vector_store %arg15[%c0_15, %26], %23 {strides = array<i32>} : memref<4x256xf32, #tpu.memory_space<vmem>>, vector<4x128xf32>,
      %c0_16 = arith.constant 0 : index
      %c0_17 = arith.constant 0 : index
      %28 = vector.load %arg16[%c0_16, %c0_17] : memref<4x1xf32, #tpu.memory_space<vmem>>, vector<4x1xf32>
      %cst_18 = arith.constant dense<0.000000e+00> : vector<4xf32>
      %29 = vector.multi_reduction <add>, %13, %cst_18 [1] : vector<4x128xf32> to vector<4xf32>
      %30 = vector.shape_cast %29 : vector<4xf32> to vector<4x1xf32>
      %31 = arith.addf %28, %30 : vector<4x1xf32>
      %c0_19 = arith.constant 0 : index
      %c0_20 = arith.constant 0 : index
      %32 = vector.load %arg16[%c0_19, %c0_20] : memref<4x1xf32, #tpu.memory_space<vmem>>, vector<4x1xf32>
      tpu.vector_store %arg16[%c0_19, %c0_20], %31 {strides = array<i32>} : memref<4x1xf32, #tpu.memory_space<vmem>>, vector<4x1xf32>,
      %c0_21 = arith.constant 0 : index
      %c0_22 = arith.constant 0 : index
      %33 = vector.load %arg17[%c0_21, %c0_22] : memref<4x1xf32, #tpu.memory_space<vmem>>, vector<4x1xf32>
      %cst_23 = arith.constant dense<0.000000e+00> : vector<4xf32>
      %34 = vector.multi_reduction <add>, %23, %cst_23 [1] : vector<4x128xf32> to vector<4xf32>
      %35 = vector.shape_cast %34 : vector<4xf32> to vector<4x1xf32>
      %36 = arith.addf %33, %35 : vector<4x1xf32>
      %c0_24 = arith.constant 0 : index
      %c0_25 = arith.constant 0 : index
      %37 = vector.load %arg17[%c0_24, %c0_25] : memref<4x1xf32, #tpu.memory_space<vmem>>, vector<4x1xf32>
      tpu.vector_store %arg17[%c0_24, %c0_25], %36 {strides = array<i32>} : memref<4x1xf32, #tpu.memory_space<vmem>>, vector<4x1xf32>,
      %c1_i32_26 = arith.constant 1 : i32
      %38 = arith.cmpi eq, %arg2, %c1_i32_26 : i32
      %39 = arith.extui %38 : i1 to i32
      %c0_i32_27 = arith.constant 0 : i32
      %40 = arith.cmpi ne, %39, %c0_i32_27 : i32
      scf.if %40 {
        %c0_28 = arith.constant 0 : index
        %c0_29 = arith.constant 0 : index
        %41 = vector.load %arg9[%c0_28, %c0_29] : memref<4x1xf32, #tpu.memory_space<vmem>>, vector<4x1xf32>
        %c0_30 = arith.constant 0 : index
        %c0_31 = arith.constant 0 : index
        %42 = vector.load %arg16[%c0_30, %c0_31] : memref<4x1xf32, #tpu.memory_space<vmem>>, vector<4x1xf32>
        %43 = arith.mulf %41, %42 : vector<4x1xf32>
        %c0_32 = arith.constant 0 : index
        %c0_33 = arith.constant 0 : index
        %44 = vector.load %arg10[%c0_32, %c0_33] : memref<4x1xf32, #tpu.memory_space<vmem>>, vector<4x1xf32>
        %c0_34 = arith.constant 0 : index
        %c0_35 = arith.constant 0 : index
        %45 = vector.load %arg17[%c0_34, %c0_35] : memref<4x1xf32, #tpu.memory_space<vmem>>, vector<4x1xf32>
        %46 = arith.mulf %44, %45 : vector<4x1xf32>
        %47 = arith.addf %43, %46 : vector<4x1xf32>
        %cst_36 = arith.constant dense<0.000000e+00> : vector<1xf32>
        %48 = vector.multi_reduction <add>, %47, %cst_36 [0] : vector<4x1xf32> to vector<1xf32>
        %49 = vector.shape_cast %48 : vector<1xf32> to vector<1x1xf32>
        %c0_37 = arith.constant 0 : index
        %c0_38 = arith.constant 0 : index
        %50 = vector.load %arg11[%c0_37, %c0_38] : memref<1x1xf32, #tpu.memory_space<vmem>>, vector<1x1xf32>
        %51 = arith.addf %49, %50 : vector<1x1xf32>
        %c0_39 = arith.constant 0 : index
        %c0_40 = arith.constant 0 : index
        %52 = vector.load %arg18[%c0_39, %c0_40] : memref<1x1xf32, #tpu.memory_space<vmem>>, vector<1x1xf32>
        tpu.vector_store %arg18[%c0_39, %c0_40], %51 {strides = array<i32>} : memref<1x1xf32, #tpu.memory_space<vmem>>, vector<1x1xf32>,
      } else {
      }
    } else {
    }
    %c1_i32 = arith.constant 1 : i32
    %5 = arith.cmpi eq, %arg1, %c1_i32 : i32
    %6 = arith.extui %5 : i1 to i32
    %c0_i32_1 = arith.constant 0 : i32
    %7 = arith.cmpi ne, %6, %c0_i32_1 : i32
    scf.if %7 {
      %c0 = arith.constant 0 : index
      %8 = arith.index_cast %1 : i32 to index
      %9 = vector.load %arg14[%c0, %8] : memref<4x256xf32, #tpu.memory_space<vmem>>, vector<4x128xf32>
      %c0_2 = arith.constant 0 : index
      %10 = arith.index_cast %1 : i32 to index
      %11 = vector.load %arg15[%c0_2, %10] : memref<4x256xf32, #tpu.memory_space<vmem>>, vector<4x128xf32>
      %c0_3 = arith.constant 0 : index
      %c0_4 = arith.constant 0 : index
      %12 = vector.load %arg7[%c0_3, %c0_4] : memref<1x4xf32, #tpu.memory_space<vmem>>, vector<1x4xf32>
      %cst = arith.constant dense<0.000000e+00> : vector<1x128xf32>
      %13 = tpu.matmul %12, %9, %cst {dimension_numbers = #tpu.dot_dimension_numbers<[1], [0], [0], [1], [0, 0, 1, 1], [], []>} : vector<1x4xf32>, vector<4x128xf32>, vector<1x128xf32> -> vector<1x128xf32>
      %c0_5 = arith.constant 0 : index
      %c0_6 = arith.constant 0 : index
      %14 = vector.load %arg8[%c0_5, %c0_6] : memref<1x4xf32, #tpu.memory_space<vmem>>, vector<1x4xf32>
      %cst_7 = arith.constant dense<0.000000e+00> : vector<1x128xf32>
      %15 = tpu.matmul %14, %11, %cst_7 {dimension_numbers = #tpu.dot_dimension_numbers<[1], [0], [0], [1], [0, 0, 1, 1], [], []>} : vector<1x4xf32>, vector<4x128xf32>, vector<1x128xf32> -> vector<1x128xf32>
      %16 = arith.addf %13, %15 : vector<1x128xf32>
      %c0_8 = arith.constant 0 : index
      %c0_9 = arith.constant 0 : index
      %17 = vector.load %arg18[%c0_8, %c0_9] : memref<1x1xf32, #tpu.memory_space<vmem>>, vector<1x1xf32>
      %18 = vector.broadcast %17 : vector<1x1xf32> to vector<1x128xf32>
      %19 = arith.addf %16, %18 : vector<1x128xf32>
      %20 = arith.negf %19 : vector<1x128xf32>
      %21 = math.exp %20 : vector<1x128xf32>
      %cst_10 = arith.constant 1.000000e+00 : f32
      %22 = vector.broadcast %cst_10 : f32 to vector<1x128xf32>
      %23 = arith.addf %22, %21 : vector<1x128xf32>
      %24 = arith.divf %22, %23 : vector<1x128xf32>
      %cst_11 = arith.constant 1.000000e+00 : f32
      %25 = vector.broadcast %cst_11 : f32 to vector<1x128xf32>
      %26 = arith.subf %25, %24 : vector<1x128xf32>
      %27 = vector.broadcast %24 : vector<1x128xf32> to vector<4x128xf32>
      %28 = arith.mulf %27, %9 : vector<4x128xf32>
      %29 = vector.broadcast %26 : vector<1x128xf32> to vector<4x128xf32>
      %30 = arith.mulf %29, %11 : vector<4x128xf32>
      %31 = arith.addf %28, %30 : vector<4x128xf32>
      %c0_12 = arith.constant 0 : index
      %c0_13 = arith.constant 0 : index
      %c0_14 = arith.constant 0 : index
      %32 = vector.load %arg12[%c0_12, %c0_13, %c0_14] : memref<1x4x128xf32, #tpu.memory_space<vmem>>, vector<1x4x128xf32>
      %33 = vector.shape_cast %32 : vector<1x4x128xf32> to vector<4x128xf32>
      %34 = vector.shape_cast %31 : vector<4x128xf32> to vector<1x4x128xf32>
      tpu.vector_store %arg12[%c0_12, %c0_13, %c0_14], %34 {strides = array<i32>} : memref<1x4x128xf32, #tpu.memory_space<vmem>>, vector<1x4x128xf32>,
      %c0_15 = arith.constant 0 : index
      %c0_16 = arith.constant 0 : index
      %c0_17 = arith.constant 0 : index
      %35 = vector.load %arg13[%c0_15, %c0_16, %c0_17] : memref<1x2x128xf32, #tpu.memory_space<vmem>>, vector<1x1x128xf32>
      %36 = vector.shape_cast %35 : vector<1x1x128xf32> to vector<1x128xf32>
      %37 = vector.shape_cast %24 : vector<1x128xf32> to vector<1x1x128xf32>
      tpu.vector_store %arg13[%c0_15, %c0_16, %c0_17], %37 {strides = array<i32>} : memref<1x2x128xf32, #tpu.memory_space<vmem>>, vector<1x1x128xf32>,
      %c0_18 = arith.constant 0 : index
      %c1 = arith.constant 1 : index
      %c0_19 = arith.constant 0 : index
      %38 = vector.load %arg13[%c0_18, %c1, %c0_19] : memref<1x2x128xf32, #tpu.memory_space<vmem>>, vector<1x1x128xf32>
      %39 = vector.shape_cast %38 : vector<1x1x128xf32> to vector<1x128xf32>
      %40 = vector.shape_cast %26 : vector<1x128xf32> to vector<1x1x128xf32>
      tpu.vector_store %arg13[%c0_18, %c1, %c0_19], %40 {strides = array<i32>} : memref<1x2x128xf32, #tpu.memory_space<vmem>>, vector<1x1x128xf32>,
    } else {
    }
    return
  }
  func.func @transform_0(%arg0: i32, %arg1: i32, %arg2: i32) -> (i32, i32, i32) {
    %c1_i32 = arith.constant 1 : i32
    %0 = arith.subi %c1_i32, %arg1 : i32
    %1 = arith.muli %arg2, %0 : i32
    %c0_i32 = arith.constant 0 : i32
    %c0_i32_0 = arith.constant 0 : i32
    return %arg0, %c0_i32, %1 : i32, i32, i32
  }
  func.func @transform_1(%arg0: i32, %arg1: i32, %arg2: i32) -> (i32, i32, i32) {
    %c1_i32 = arith.constant 1 : i32
    %0 = arith.subi %c1_i32, %arg1 : i32
    %1 = arith.muli %arg2, %0 : i32
    %c0_i32 = arith.constant 0 : i32
    %c0_i32_0 = arith.constant 0 : i32
    return %arg0, %c0_i32, %1 : i32, i32, i32
  }
  func.func @transform_2(%arg0: i32, %arg1: i32, %arg2: i32) -> (i32, i32) {
    %c0_i32 = arith.constant 0 : i32
    %c0_i32_0 = arith.constant 0 : i32
    %c0_i32_1 = arith.constant 0 : i32
    return %c0_i32, %c0_i32_0 : i32, i32
  }
  func.func @transform_3(%arg0: i32, %arg1: i32, %arg2: i32) -> (i32, i32) {
    %c0_i32 = arith.constant 0 : i32
    %c0_i32_0 = arith.constant 0 : i32
    %c0_i32_1 = arith.constant 0 : i32
    return %c0_i32, %c0_i32_0 : i32, i32
  }
  func.func @transform_4(%arg0: i32, %arg1: i32, %arg2: i32) -> (i32, i32) {
    %c0_i32 = arith.constant 0 : i32
    %c0_i32_0 = arith.constant 0 : i32
    %c0_i32_1 = arith.constant 0 : i32
    return %c0_i32, %c0_i32_0 : i32, i32
  }
  func.func @transform_5(%arg0: i32, %arg1: i32, %arg2: i32) -> (i32, i32) {
    %c0_i32 = arith.constant 0 : i32
    %c0_i32_0 = arith.constant 0 : i32
    %c0_i32_1 = arith.constant 0 : i32
    return %c0_i32, %c0_i32_0 : i32, i32
  }
  func.func @transform_6(%arg0: i32, %arg1: i32, %arg2: i32) -> (i32, i32) {
    %c0_i32 = arith.constant 0 : i32
    %c0_i32_0 = arith.constant 0 : i32
    %c0_i32_1 = arith.constant 0 : i32
    return %c0_i32, %c0_i32_0 : i32, i32
  }
  func.func @transform_7(%arg0: i32, %arg1: i32, %arg2: i32) -> (i32, i32) {
    %c0_i32 = arith.constant 0 : i32
    %c0_i32_0 = arith.constant 0 : i32
    %c0_i32_1 = arith.constant 0 : i32
    return %c0_i32, %c0_i32_0 : i32, i32
  }
  func.func @transform_8(%arg0: i32, %arg1: i32, %arg2: i32) -> (i32, i32) {
    %c0_i32 = arith.constant 0 : i32
    %c0_i32_0 = arith.constant 0 : i32
    %c0_i32_1 = arith.constant 0 : i32
    return %c0_i32, %c0_i32_0 : i32, i32
  }
  func.func @transform_9(%arg0: i32, %arg1: i32, %arg2: i32) -> (i32, i32, i32) {
    %0 = arith.muli %arg2, %arg1 : i32
    %c0_i32 = arith.constant 0 : i32
    %c0_i32_0 = arith.constant 0 : i32
    return %arg0, %c0_i32, %0 : i32, i32, i32
  }
  func.func @transform_10(%arg0: i32, %arg1: i32, %arg2: i32) -> (i32, i32, i32) {
    %0 = arith.muli %arg2, %arg1 : i32
    %c0_i32 = arith.constant 0 : i32
    %c0_i32_0 = arith.constant 0 : i32
    return %arg0, %c0_i32, %0 : i32, i32, i32
  }
}

</mosaic_0001>

<bundles_post_ra>
// kernel: tpu_custom_call.1
= control target key start
LH: loop header
LB: loop body
LE: loop exit
PB: predicated region body
PF: predicated region fallthrough
CT: control target
= control target key end

     0   :  { %s1817_s0 = inlined_call_operand.hbm [shape: bf16[2,4,256], index: 0, kind: input, shape index: {}]   ;;  %s1818_s1 = inlined_call_operand.vmem [shape: bf16[2,8,256], index: 1, kind: input, shape index: {}]   ;;  %s1819_s2 = inlined_call_operand.vmem [shape: f32[4,8], index: 2, kind: input, shape index: {}]   ;;  %s1820_s3 = inlined_call_operand.vmem [shape: f32[4,1], index: 3, kind: input, shape index: {}]   ;;  %s1821_s4 = inlined_call_operand.vmem [shape: f32[1,4], index: 4, kind: input, shape index: {}]   ;;  %s1822_s5 = inlined_call_operand.vmem [shape: f32[1,4], index: 5, kind: input, shape index: {}]   ;;  %s1823_s6 = inlined_call_operand.vmem [shape: f32[4,1], index: 6, kind: input, shape index: {}]   ;;  %s1824_s7 = inlined_call_operand.vmem [shape: f32[4,1], index: 7, kind: input, shape index: {}]   ;;  %s1825_s8 = inlined_call_operand.<no memory space> [shape: f32[1,1], index: 8, kind: input, shape index: {}]   ;;  %s1826_s9 = inlined_call_operand.hbm [shape: f32[2,4,256], index: 9, kind: output, shape index: {0}]   ;;  %s1827_s10 = inlined_call_operand.hbm [shape: f32[2,2,256], index: 10, kind: output, shape index: {1}]  }
   0x1   :  { %1837 = sst [smem:[#allocation22_spill]] %s1817_s0  ;;  %v16_v0 = vstv %s1825_s8 }
   0x2   :  { %1838 = sst [smem:[#allocation23_spill]] %s1819_s2  ;;  %17 = vst [vmem:[#allocation7] sm:$0x1] %v16_v0 }
   0x3   :  { %1839 = sst [smem:[#allocation24_spill]] %s1820_s3 }
   0x4   :  { %1840 = sst [smem:[#allocation25_spill]] %s1821_s4 }
   0x5   :  { %1841 = sst [smem:[#allocation26_spill]] %s1822_s5 }
   0x6   :  { %1842 = sst [smem:[#allocation27_spill]] %s1823_s6 }
   0x7   :  { %1843 = sst [smem:[#allocation28_spill]] %s1824_s7 }
   0x8   :  { %1844 = sst [smem:[#allocation29_spill]] %s1826_s9 }
   0x9   :  { %1845 = sst [smem:[#allocation30_spill]] %s1827_s10 }
   0xa   :  { %18 = vsyncpa [#allocation9], 0 }
   0xb   :  { %20 = vsyncpa [#allocation9 + $0x1], 0 }
   0xc   :  { %21 = vsyncpa [#allocation10], 0 }
   0xd   :  { %23 = vsyncpa [#allocation10 + $0x1], 0 }
   0xe   :  { %24 = vsyncpa [#allocation13], 0 }
   0xf   :  { %26 = vsyncpa [#allocation13 + $0x1], 0  ;;  %s1468_s15 = smov 0   ;;  %s1470_s16 = smov 0  }
  0x10   :  { %s1472_s17 = smov 0   ;;  %s1474_s18 = smov 0  }
  0x11   :  { %s1476_s19 = smov 0   ;;  %s1478_s20 = smov 0  }
  0x12   :  { %s1480_s8 = smov 0   ;;  %s1482_s21 = smov 0  }
  0x13   :  { %s1484_s22 = smov 0   ;;  %s1486_s23 = smov 0  }
  0x14   :  { %s1488_s24 = smov 0   ;;  %s1490_s25 = smov 0  }
  0x15   :  { %s1492_s26 = smov 0  }
  0x16 LB: > { %1846 = sst [smem:[#allocation17_spill]] %s1386_s23  ;;  %s1829_s27 = sadd.s32 4294967295, %s1398_s26   ;;  %s1398_s26 = sphi %s1492_s26, %s32_s26   ;;  %s1394_s25 = sphi %s1490_s25, %s1886_s25   ;;  %s1390_s24 = sphi %s1488_s24, %s1885_s24   ;;  %s1386_s23 = sphi %s1486_s23, %s1875_s23   ;;  %s1382_s22 = sphi %s1484_s22, %s1884_s22   ;;  %s1378_s21 = sphi %s1482_s21, %s1874_s21   ;;  %s1374_s8 = sphi %s1480_s8, %s1873_s8   ;;  %s1370_s20 = sphi %s1478_s20, %s1883_s20   ;;  %s1366_s19 = sphi %s1476_s19, %s1882_s19   ;;  %s1362_s18 = sphi %s1474_s18, %s1881_s18   ;;  %s1358_s17 = sphi %s1472_s17, %s1880_s17   ;;  %s1354_s16 = sphi %s1470_s16, %s1879_s16   ;;  %s1350_s15 = sphi %s1468_s15, %s1878_s15  }
  0x17   : > { %1847 = sst [smem:[#allocation18_spill]] %s1390_s24  ;;  %s44_s29 = sadd.s32 1, %s1386_s23 }
  0x18   : > { %s47_s30 = sadd.s32 1, %s1390_s24  ;;  %p45_p0 = scmp.ge.s32.totalorder %s44_s29, 2 }
  0x19   : > { %s51_s11 = sadd.s32 1, %s1394_s25  ;;  %s55_s12 = ssub.s32 1, %s1390_s24 }
  0x1a   : > { %s64_s13 = sadd.s32 1, %s1370_s20  ;;  %s1888_s29 = smov (%p45_p0, %s44_s29), 0 }
  0x1b   : > { %1848 = sst [smem:[#allocation19_spill]] %s1888_s29  ;;  %s1890_s30 = smov (!%p45_p0, %s47_s30), %s1390_s24 }
  0x1c   : > { %s1544_s14 = smul.u32 %s1386_s23, %s55_s12  ;;  %p71_p1 = scmp.ne.s32.totalorder %s1370_s20, %s1366_s19 }
  0x1d   : > { %p49_p2 = scmp.ge.s32.totalorder %s1890_s30, 2  ;;  %p72_p3 = scmp.eq.s32.totalorder %s1398_s26, 0 }
  0x1e   : > { %p77_p4 = scmp.ne.s32.totalorder %s1366_s19, %s1362_s18  ;;  %p78_p5 = scmp.eq.s32.totalorder %s1829_s27, 0 }
  0x1f   : > { %s1892_s30 = smov (%p49_p2, %s1890_s30), 0  ;;  %s1894_s11 = smov (!%p49_p2, %s51_s11), %s1394_s25 }
  0x20   : > { %1849 = sst [smem:[#allocation20_spill]] %s1892_s30  ;;  %s57_s28 = ssub.s32 1, %s1892_s30 }
  0x21   : > { %p1557_p6 = por %p72_p3, %p71_p1  ;;  %p53_p7 = scmp.ge.s32.totalorder %s1894_s11, 2 }
  0x22   : > { %s58_s10 = smul.u32 %s57_s28, %s1888_s29  ;;  %p1562_p8 = por %p78_p5, %p77_p4 }
  0x23   : > { %s266_s27 = smul.u32 %s1386_s23, %s1390_s24  ;;  %s1896_s11 = smov (%p53_p7, %s1894_s11), 0 }
  0x24   : > { %1852 = sst [smem:[#allocation21_spill]] %s1896_s11  ;;  %s60_s9 = ssub.s32 %s1544_s14, %s58_s10 }
  0x25   : > { %s267_s4 = smul.u32 %s1892_s30, %s1888_s29  ;;  %s59_s5 = ssub.s32 %s1394_s25, %s1896_s11 }
  0x26   : > { %s273_s7 = sadd.s32 1, %s1358_s17  ;;  %s61_s6 = sor.u32 %s60_s9, %s59_s5 }
  0x27   : > { %s269_s28 = ssub.s32 %s266_s27, %s267_s4  ;;  %p62_p9 = scmp.eq.s32.totalorder %s61_s6, 0 }
  0x28   : > { %s270_s3 = sor.u32 %s269_s28, %s59_s5  ;;  %p283_p11 = scmp.ne.s32.totalorder %s1358_s17, %s1354_s16 }
  0x29   : > { %p271_p10 = scmp.eq.s32.totalorder %s270_s3, 0  ;;  %s1853_s23 = sadd.s32 4294967295, %s1398_s26  }
  0x2a   : > { %s1579_s2 = scalar_select %p62_p9, %s1370_s20, %s64_s13  }
  0x2b   : > { %s1582_s24 = scalar_select %p271_p10, %s1358_s17, %s273_s7  }
  0x2c   : > { %p284_p12 = scmp.eq.s32.totalorder %s1853_s23, 7  ;;  %p289_p13 = scmp.ne.s32.totalorder %s1354_s16, %s1350_s15 }
  0x2d   : > { %s1854_s10 = sadd.s32 4294967294, %s1398_s26   ;;  %p1079_p2 = scmp.lt.s32.totalorder %s1398_s26, 8 }
  0x2e   : > { %p290_p0 = scmp.eq.s32.totalorder %s1854_s10, 7  ;;  %p1590_p1 = por %p284_p12, %p283_p11 }
  0x2f   : > { %s361_s4 = sand.u32 1, %s1370_s20   ;;  %s1010_s6 = sshll.u32 %s1394_s25, 1 }
  0x30   : > { %s1855_s9 = scalar_select %p1590_p1, 1, 0 }
  0x31   : > { %p1595_p3 = por %p290_p0, %p289_p13  ;;  %s1009_s5 = sshll.u32 %s361_s4, 1 }
  0x32   : > { %s372_s7 = sadd.s32 %s1010_s6, %s1544_s14  ;;  %s365_s27 = scalar_lea.vmem [#allocation8], %s1009_s5 }
  0x33   : > { %s1856_s3 = scalar_select %p1595_p3, 1, 0 }
  0x34   : > { %s376_s23 = sshll.u32 %s365_s27, 4  ;;  %s1011_s13 = sshll.u32 %s372_s7, 5  ;;  %s1602_s23 = int_to_ptr.vmem [resolvable:$true] %s376_s23 }
  0x35   : > { %s1857_s0 = sld [smem:[#allocation22_spill]]  ;;  %p1611_p4 = pnand %p1079_p2, %p1557_p6 }
  0x36   : > { %s362_s14 = scalar_lea.sflag [#allocation9], %s361_s4 }
  0x37   : > { %p1200_p10 = pneg %p1611_p4 }
  0x3b   : > { %s1607_s11 = scalar_lea.hbm %s1857_s0, %s1011_s13  ;;  %s1203_s7 = scalar_lea.hbm %s1857_s0, 128 }
  0x3c   : > { %s1198_s5 = scalar_lea.hbm %s1607_s11, 32  ;;  %p1204_p6 = scmp.lt.u32.totalorder %s1607_s11, %s1857_s0 }
  0x3d   : > { %p1199_p9 = scmp.ne.s32.totalorder %s1607_s11, %s1198_s5  ;;  %p1205_p13 = scmp.lt.u32.totalorder %s1203_s7, %s1198_s5 }
  0x3e   : > { %p1207_p2 = scmp.lt.u32.totalorder %s1198_s5, %s1607_s11 }
  0x3f   : > { %p1201_p11 = pnand %p1200_p10, %p1199_p9  ;;  %p1206_p0 = por %p1205_p13, %p1204_p6 }
  0x41   : > { %p1202_p12 = pneg %p1201_p11  ;;  %p1208_p5 = por %p1207_p2, %p1206_p0 }
  0x43   : > { %p1209_p7 = pnand %p1208_p5, %p1202_p12 }
  0x45   : > { %1212 = shalt.err (!%p1209_p7)
}
  0x46   : > { %s1213_s4 = scalar_lea.vmem %s1602_s23, 32  ;;  %s1400_s28 = smov [#allocation8]  }
  0x47   : > { %p1214_p9 = scmp.ne.s32.totalorder %s1602_s23, %s1213_s4  ;;  %s1218_s10 = sshll.u32 %s1400_s28, 4  ;;  %s1219_s10 = int_to_ptr.vmem [resolvable:$false] %s1218_s10 }
  0x48   : > { %s1220_s12 = scalar_lea.vmem %s1219_s10, 64  ;;  %p1221_p1 = scmp.lt.s32.totalorder %s1602_s23, %s1219_s10 }
  0x49   : > { %p1216_p11 = pnand %p1214_p9, %p1200_p10  ;;  %p1222_p6 = scmp.lt.s32.totalorder %s1220_s12, %s1213_s4 }
  0x4b   : > { %p1217_p3 = pneg %p1216_p11  ;;  %p1223_p13 = por %p1222_p6, %p1221_p1 }
  0x4d   : > { %p1224_p0 = pnand %p1223_p13, %p1217_p3 }
  0x4f   : > { %1227 = shalt.err (!%p1224_p0)
}
  0x50   : > { %1071 = dma.hbm_to_vmem [thread:$0]  (!%p1611_p4), %s1607_s11, 32, %s1602_s23, %s362_s14  }
  0x51   : > { %p1859_p5 = scmp.lt.s32.totalorder %s1398_s26, 9  ;;  %p1860_p7 = scmp.ge.s32.totalorder %s1398_s26, 1 }
  0x53   : > { %p397_p10 = pnand %p1860_p7, %p1859_p5 }
  0x54   : > { %s402_s5 = sand.u32 (!%p397_p10), 1, %s1366_s19  }
  0x55   : > { %400 = sbr.rel (%p397_p10) target bundleno = 824 (0x338), region = 56  ;;  %s1647_s6 = sshll.u32 (!%p397_p10), %s402_s5, 1 }
  0x56   : > { %s403_s7 = scalar_lea.sflag (!%p397_p10), [#allocation9], %s402_s5 }
  0x5c   : > { %1337 = dma.done.wait (%p1562_p8), %s403_s7, 32  }
  0x5d   : > { %1339 = vsyncadd (%p1562_p8), %s403_s7, 4294967264  ;;  %s1655_s30 = sand.u32 1, %s1354_s16   ;;  %s460_s11 = ssub.s32 1, %s1378_s21 }
  0x5e   : > { %s1014_s23 = sshll.u32 %s1655_s30, 2  ;;  %s1015_s14 = sshll.u32 %s1655_s30, 1 }
  0x5f   : > { %s461_s13 = smul.u32 %s1374_s8, %s460_s11  ;;  %p462_p1 = scmp.lt.s32.totalorder %s1382_s22, 1 }
  0x60   : > { %s1018_s4 = sshll.u32 %s1374_s8, 7  ;;  %s1667_s0 = scalar_lea.vmem [#allocation11], %s1014_s23 }
  0x61   : > { %s463_s28 = scalar_select %p462_p1, %s1382_s22, 1 }
  0x62   : > { %p464_p3 = scmp.lt.s32.totalorder %s461_s13, 1  ;;  %s1669_s29 = scalar_lea.vmem [#allocation12], %s1015_s14 }
  0x63   : > { %s1016_s18 = sshll.u32 %s463_s28, 1  ;;  %p1019_p8 = scmp.ne.s32.totalorder %s1378_s21, 0 }
  0x64   : > { %s1898_s13 = smov (!%p464_p3, %s461_s13), 1  ;;  %p1020_p4 = scmp.ne.s32.totalorder (!%p1019_p8), %s1374_s8, 0 }
  0x65   : > { %s467_s10 = sadd.s32 %s1016_s18, %s1898_s13  ;;  %478 = sbr.rel (%p1019_p8) target bundleno = 511 (0x1ff), region = 64 }
  0x66   : > { %s1017_s12 = sshll.u32 %s467_s10, 2 }
  0x67   : > { %s469_s27 = scalar_lea.vmem %s1818_s1, %s1017_s12 }
  0x6c   : > { %482 = sbr.rel (%p1020_p4) target bundleno = 115 (0x73), region = 68  ;;  %vm483_vm0 = vcmask (!%p1020_p4), 3072   ;;  %v1401_v1 = vmov (!%p1020_p4), 0.0  }
  0x6d   : > { %484 = vst.msk [vmem:[#allocation4] sm:$0xf] (!%p1020_p4), %vm483_vm0, %v1401_v1  ;;  %485 = vst.msk [vmem:[#allocation5] sm:$0xf] (!%p1020_p4), %vm483_vm0, %v1401_v1 }
  0x73 PF: > { %v488_v2 = vld [vmem:[%s469_s27] sm:$0xf]  ;;  %v1402_v3 = vmov 0.0   ;;  %vm1403_vm1 = vmmov 0   ;;  %s1861_s14 = sld [smem:[#allocation23_spill]]  ;;  %vm497_vm2 = vcmask 64512  }
  0x74   : > { %1047 = vmatprep.subr.mxu0 %v1402_v3  ;;  %v489_v4 = vunpack.c.l.bf16 %v488_v2  ;;  %1049 = vmatprep.mubr.msk.f32.mxu0 %vm1403_vm1, %v1402_v3  ;;  %s1862_s18 = sld [smem:[#allocation24_spill]]  ;;  %v1404_v7 = vmov 0   ;;  %s572_s27 = sshra.s32 %s1018_s4, 7  ;;  %vm581_vm3 = vcmask 1043456   ;;  %vm586_vm4 = vcmask 3072  }
  0x75   : > { %1192 = vset.pattern.permute.xlu0 %v1404_v7  ;;  %s1863_s10 = scalar_lea.vmem [#allocation8], %s1647_s6  ;;  %s1022_s12 = sshll.u32 %s572_s27, 2  ;;  %v580_v17 = vld [vmem:[#allocation4] sm:$0xf]  ;;  %v588_v20 = vld [vmem:[#allocation5] sm:$0xf] }
  0x76   : > { %1048 = vmatpush3.msra.mxu0 %v489_v4  ;;  %v486_v8 = vld [vmem:[%s1863_s10] sm:$0x3]  ;;  %s575_s5 = scalar_lea.vmem [#allocation2], %s1022_s12  ;;  %s578_s7 = scalar_lea.vmem [#allocation3], %s1022_s12 }
  0x77   : > { %v487_v9 = vunpack.c.l.bf16 %v486_v8  ;;  %p1024_p12 = scmp.ne.s32.totalorder %s1374_s8, 1 }
  0x78   : > { %s1864_s23 = sld [smem:[#allocation27_spill]] (!%p1024_p12)  ;;  %s1865_s28 = sld [smem:[#allocation28_spill]] (!%p1024_p12)  ;;  %v612_v36 = vld [vmem:[#allocation7] sm:$0x1] (!%p1024_p12)  ;;  %vm614_vm5 = vcmask (!%p1024_p12), 0  }
  0x79   : > { %v490_v5 = vld [vmem:[%s1861_s14] sm:$0xf]  ;;  %v582_v10 = vsel %vm581_vm3, %v487_v9, 0.0  ;;  %576 = vst [vmem:[%s575_s5] sm:$0xf] %v487_v9 }
  0x7a   : > { %v491_v6 = vld [vmem:[%s1862_s18] sm:$0xf]  ;;  %1050 = vmatmul.mubr.msk.f32.vlgmr.msra.gmra.mrb[0].mxu0 %vm497_vm2, %v490_v5 }
  0x7b   : > { %494 = vperm.xlu0 %1192, %v491_v6  }
  0x7e   : > { %v598_v23 = vld [vmem:[%s1864_s23] sm:$0xf] (!%p1024_p12) }
  0x7f   : > { %v601_v25 = vld [vmem:[%s1865_s28] sm:$0xf] (!%p1024_p12) }
  0x9a   : > { %583 = vadd.xlane.f32.xlu0 %v582_v10 }
  0xfa   : > { %v495_v11 = vpop.permute.xlu0 %494 }
 0x127   : > { %v584_v18 = vpop.xlane.xlu0 %583 }
 0x128   : > { %v585_v19 = vadd.f32 %v584_v18, %v580_v17 }
 0x12a   : > { %587 = vst.msk [vmem:[#allocation4] sm:$0xf] %vm586_vm4, %v585_v19 }
 0x131   : > { %v599_v24 = vld [vmem:[#allocation4] sm:$0xf] (!%p1024_p12) }
 0x132   : > { %v600_v26 = vmul.f32 (!%p1024_p12), %v599_v24, %v598_v23 }
 0x14d   : > { %v567_v12 = vpop.f32.mrb[0].mxu0 }
 0x14e   : > { %v568_v13 = vadd.f32 %v567_v12, %v495_v11  ;;  %v1051_v14 = vpop.f32.mrb[1].mxu0 }
 0x150   : > { %v571_v15 = vmax.f32 %v568_v13, 0.0 }
 0x152   : > { %579 = vst [vmem:[%s578_s7] sm:$0xf] %v571_v15  ;;  %v589_v16 = vsel %vm581_vm3, %v571_v15, 0.0 }
 0x153   : > { %590 = vadd.xlane.f32.xlu1 %v589_v16 }
 0x1dd   : > { %597 = sbr.rel (%p1024_p12) target bundleno = 511 (0x1ff), region = 72 }
 0x1e0   : > { %v591_v21 = vpop.xlane.xlu1 %590 }
 0x1e1   : > { %v592_v22 = vadd.f32 %v591_v21, %v588_v20 }
 0x1e3   : > { %593 = vst.msk [vmem:[#allocation5] sm:$0xf] %vm586_vm4, %v592_v22 }
 0x1ea   : > { %v602_v27 = vld [vmem:[#allocation5] sm:$0xf] }
 0x1eb   : > { %v603_v28 = vmul.f32 %v602_v27, %v601_v25 }
 0x1ed   : > { %v604_v29 = vadd.f32 %v603_v28, %v600_v26 }
 0x1ef   : > { %v605_v30 = vsel %vm586_vm4, %v604_v29, 0.0 }
 0x1f0   : > { %v606_v31 = vrot.slane %v605_v30, 4 }
 0x1f2   : > { %v607_v32 = vadd.f32 %v606_v31, %v605_v30 }
 0x1f4   : > { %v608_v33 = vrot.slane %v607_v32, 2 }
 0x1f6   : > { %v609_v34 = vadd.f32 %v608_v33, %v607_v32 }
 0x1f8   : > { %v610_v35 = vrot.slane %v609_v34, 1 }
 0x1fa   : > { %v611_v37 = vadd.f32 %v610_v35, %v609_v34 }
 0x1fc   : > { %v613_v38 = vadd.f32 %v612_v36, %v611_v37 }
 0x1fe   : > { %615 = vst.msk [vmem:[#allocation6] sm:$0x1] %vm614_vm5, %v613_v38 }
 0x1ff PF: > { %p1025_p2 = scmp.ne.s32.totalorder %s1378_s21, 1 }
 0x200   : > { %s620_s18 = sshra.s32 (!%p1025_p2), %s1018_s4, 7  ;;  %v1405_v39 = vmov (!%p1025_p2), 0.0   ;;  %vm634_vm6 = vcmask (!%p1025_p2), 1043456   ;;  %s1866_s5 = sld [smem:[#allocation26_spill]] (!%p1025_p2)  ;;  %vm1406_vm7 = vmmov (!%p1025_p2), 0   ;;  %vm630_vm8 = vcmask (!%p1025_p2), 31744  }
 0x201   : > { %619 = sbr.rel (%p1025_p2) target bundleno = 772 (0x304), region = 76  ;;  %1052 = vmatprep.subr.mxu0 (!%p1025_p2), %v1405_v39  ;;  %1057 = vmatprep.subr.mxu1 (!%p1025_p2), %v1405_v39  ;;  %s1026_s27 = sshll.u32 (!%p1025_p2), %s620_s18, 2  ;;  %v1407_v44 = vmov (!%p1025_p2), 0   ;;  %v790_v46 = vlaneseq (!%p1025_p2) }
 0x202   : > { %1054 = vmatprep.mubr.msk.f32.mxu0 (!%p1025_p2), %vm1406_vm7, %v1405_v39  ;;  %1059 = vmatprep.mubr.msk.f32.mxu1 (!%p1025_p2), %vm1406_vm7, %v1405_v39  ;;  %s1867_s11 = sld [smem:[#allocation25_spill]] (!%p1025_p2)  ;;  %s626_s23 = scalar_lea.vmem (!%p1025_p2), [#allocation3], %s1026_s27 }
 0x203   : > { %v627_v42 = vld [vmem:[%s626_s23] sm:$0xf] (!%p1025_p2)  ;;  %s623_s4 = scalar_lea.vmem (!%p1025_p2), [#allocation2], %s1026_s27  ;;  %1193 = vset.pattern.permute.xlu0 (!%p1025_p2), %v1407_v44  ;;  %v791_v47 = vshrl.u32 (!%p1025_p2), %v790_v46, 7 }
 0x204   : > { %v624_v43 = vld [vmem:[%s623_s4] sm:$0xf] (!%p1025_p2)  ;;  %1053 = vmatpush3.msk.msra.mxu0 (!%p1025_p2), %vm634_vm6, %v627_v42 }
 0x205   : > { %v784_v45 = vld [vmem:[#allocation6] sm:$0x1] (!%p1025_p2)  ;;  %1058 = vmatpush3.msk.msra.mxu1 (!%p1025_p2), %vm634_vm6, %v624_v43  ;;  %v792_v48 = vsub.s32 (!%p1025_p2), 0, %v791_v47 }
 0x206   : > { %v629_v40 = vld [vmem:[%s1866_s5] sm:$0x1] (!%p1025_p2)  ;;  %787 = vperm.xlu0 (!%p1025_p2), %1193, %v784_v45  }
 0x207   : > { %1055 = vmatmul.mubr.msk.f32.vlgmr.msra.gmra.mrb[0].mxu0 (!%p1025_p2), %vm630_vm8, %v629_v40 }
 0x208   : > { %v628_v41 = vld [vmem:[%s1867_s11] sm:$0x1] }
 0x209   : > { %1060 = vmatmul.mubr.msk.f32.vlgmr.msra.gmra.mrb[0].mxu1 %vm630_vm8, %v628_v41 }
 0x285   : > { %v788_v49 = vpop.permute.xlu0 %787 }
 0x286   : > { %v793_v50 = vrot.slane %v788_v49, %v792_v48 }
 0x2da   : > { %v704_v51 = vpop.f32.mrb[0].mxu0 }
 0x2db   : > { %v1056_v54 = vpop.f32.mrb[1].mxu0 }
 0x2dc   : > { %v780_v52 = vpop.f32.mrb[0].mxu1 }
 0x2dd   : > { %v781_v53 = vadd.f32 %v780_v52, %v704_v51  ;;  %v1061_v55 = vpop.f32.mrb[1].mxu1 }
 0x2df   : > { %v794_v56 = vadd.f32 %v793_v50, %v781_v53 }
 0x2e1   : > { %v1032_v57 = vmul.f32 -1.442695, %v794_v56 }
 0x2e3   : > { %1194 = vpow2.f32 %v1032_v57 }
 0x2ed   : > { %v1195_v58 = vpop.eup %1194 }
 0x2ee   : > { %v798_v59 = vadd.f32 1.0, %v1195_v58 }
 0x2f0   : > { %1196 = vrcp.f32 %v798_v59 }
 0x2fa   : > { %v1197_v60 = vpop.eup %1196 }
 0x2fb   : > { %v801_v61 = vsub.f32 1.0, %v1197_v60  ;;  %v805_v62 = vrot.slane %v1197_v60, %v792_v48  ;;  %814 = vst [vmem:[%s1669_s29] sm:$0x1] %v1197_v60 }
 0x2fd   : > { %v810_v63 = vrot.slane %v801_v61, %v792_v48  ;;  %815 = vst [vmem:[%s1669_s29 + $0x1] sm:$0x1] %v801_v61  ;;  %v806_v0 = vmul.f32 %v805_v62, %v624_v43 }
 0x2ff   : > { %v811_v1 = vmul.f32 %v810_v63, %v627_v42 }
 0x301   : > { %v812_v2 = vadd.f32 %v811_v1, %v806_v0 }
 0x303   : > { %813 = vst [vmem:[%s1667_s0] sm:$0xf] %v812_v2 }
 0x304 PF: > { %s829_s14 = smul.u32 %s1374_s8, %s1378_s21  ;;  %s1035_s13 = sshll.u32 %s1382_s22, 1 }
 0x305   : > { %s838_s28 = sshll.u32 %s1667_s0, 4  ;;  %s1868_s5 = sld [smem:[#allocation29_spill]]  ;;  %s1711_s28 = int_to_ptr.vmem [resolvable:$true] %s838_s28 }
 0x306   : > { %s1709_s18 = sadd.s32 %s1035_s13, %s829_s14  ;;  %s817_s11 = scalar_lea.sflag [#allocation10], %s1655_s30 }
 0x307   : > { %s1036_s27 = sshll.u32 %s1709_s18, 6  ;;  %s1038_s6 = sshll.u32 %s1709_s18, 5 }
 0x308   : > { %s1228_s8 = scalar_lea.vmem %s1711_s28, 64  ;;  %p1869_p11 = scmp.ne.s32.totalorder %s1855_s9, 0 }
 0x309   : > { %p1229_p9 = scmp.ne.s32.totalorder %s1711_s28, %s1228_s8  ;;  %s1408_s0 = smov [#allocation11]  }
 0x30a   : > { %s1232_s21 = sshll.u32 %s1408_s0, 4  ;;  %s1233_s21 = int_to_ptr.vmem [resolvable:$false] %s1232_s21 }
 0x30b   : > { %s1717_s7 = scalar_lea.hbm %s1868_s5, %s1036_s27  ;;  %p1230_p6 = pnand %p1229_p9, %p1869_p11 }
 0x30c   : > { %s1234_s22 = scalar_lea.vmem %s1233_s21, 128  ;;  %p1235_p0 = scmp.lt.s32.totalorder %s1711_s28, %s1233_s21 }
 0x30d   : > { %p1231_p13 = pneg %p1230_p6  ;;  %p1236_p5 = scmp.lt.s32.totalorder %s1234_s22, %s1228_s8 }
 0x30f   : > { %p1237_p7 = por %p1236_p5, %p1235_p0 }
 0x311   : > { %p1238_p10 = pnand %p1237_p7, %p1231_p13 }
 0x313   : > { %1241 = shalt.err (!%p1238_p10)
}
 0x314   : > { %s1242_s23 = scalar_lea.hbm %s1717_s7, 64  ;;  %s1246_s13 = scalar_lea.hbm %s1868_s5, 256 }
 0x315   : > { %p1243_p1 = scmp.ne.s32.totalorder %s1717_s7, %s1242_s23  ;;  %p1247_p4 = scmp.lt.u32.totalorder %s1717_s7, %s1868_s5 }
 0x316   : > { %p1248_p12 = scmp.lt.u32.totalorder %s1246_s13, %s1242_s23  ;;  %p1250_p9 = scmp.lt.u32.totalorder %s1242_s23, %s1717_s7 }
 0x317   : > { %p1244_p3 = pnand %p1243_p1, %p1869_p11 }
 0x318   : > { %p1249_p2 = por %p1248_p12, %p1247_p4 }
 0x319   : > { %p1245_p8 = pneg %p1244_p3 }
 0x31a   : > { %p1251_p6 = por %p1250_p9, %p1249_p2 }
 0x31c   : > { %p1252_p13 = pnand %p1251_p6, %p1245_p8 }
 0x31e   : > { %1255 = shalt.err (!%p1252_p13)
}
 0x31f   : > { %1064 = dma.vmem_to_hbm [thread:$0]  (%p1869_p11), %s1711_s28, 64, %s1717_s7, %s817_s11  }
 0x320   : > { %s1870_s0 = sld [smem:[#allocation30_spill]]  ;;  %s854_s22 = sshll.u32 %s1669_s29, 4  ;;  %s855_s22 = int_to_ptr.vmem [resolvable:$true] %s854_s22 }
 0x321   : > { %s822_s23 = scalar_lea.sflag [#allocation13], %s1655_s30  ;;  %s1256_s4 = scalar_lea.vmem %s855_s22, 32 }
 0x322   : > { %p1257_p0 = scmp.ne.s32.totalorder %s855_s22, %s1256_s4  ;;  %s1409_s14 = smov [#allocation12]  }
 0x323   : > { %s1260_s13 = sshll.u32 %s1409_s14, 4  ;;  %s1261_s13 = int_to_ptr.vmem [resolvable:$false] %s1260_s13 }
 0x324   : > { %p1258_p5 = pnand %p1257_p0, %p1869_p11  ;;  %s1262_s27 = scalar_lea.vmem %s1261_s13, 64 }
 0x325   : > { %p1263_p10 = scmp.lt.s32.totalorder %s855_s22, %s1261_s13  ;;  %p1264_p1 = scmp.lt.s32.totalorder %s1262_s27, %s1256_s4 }
 0x326   : > { %s1747_s21 = scalar_lea.hbm %s1870_s0, %s1038_s6  ;;  %p1259_p7 = pneg %p1258_p5 }
 0x327   : > { %p1265_p3 = por %p1264_p1, %p1263_p10 }
 0x329   : > { %p1266_p8 = pnand %p1265_p3, %p1259_p7 }
 0x32b   : > { %1269 = shalt.err (!%p1266_p8)
}
 0x32c   : > { %s1270_s29 = scalar_lea.hbm %s1747_s21, 32  ;;  %s1274_s18 = scalar_lea.hbm %s1870_s0, 128 }
 0x32d   : > { %p1271_p4 = scmp.ne.s32.totalorder %s1747_s21, %s1270_s29  ;;  %p1275_p9 = scmp.lt.u32.totalorder %s1747_s21, %s1870_s0 }
 0x32e   : > { %p1276_p6 = scmp.lt.u32.totalorder %s1274_s18, %s1270_s29  ;;  %p1278_p0 = scmp.lt.u32.totalorder %s1270_s29, %s1747_s21 }
 0x32f   : > { %p1272_p12 = pnand %p1271_p4, %p1869_p11 }
 0x330   : > { %p1277_p13 = por %p1276_p6, %p1275_p9 }
 0x331   : > { %p1273_p2 = pneg %p1272_p12 }
 0x332   : > { %p1279_p5 = por %p1278_p0, %p1277_p13 }
 0x334   : > { %p1280_p7 = pnand %p1279_p5, %p1273_p2 }
 0x336   : > { %1283 = shalt.err (!%p1280_p7)
}
 0x337   : > { %1065 = dma.vmem_to_hbm [thread:$0]  (%p1869_p11), %s855_s22, 32, %s1747_s21, %s822_s23  }
 0x338 PF: > { %p1080_p10 = scmp.ge.s32.totalorder %s1398_s26, 2  ;;  %s866_s11 = sand.u32 1, %s1350_s15  }
 0x339   : > { %p1871_p1 = scmp.ne.s32.totalorder %s1856_s3, 0  ;;  %s867_s10 = scalar_lea.sflag [#allocation10], %s866_s11 }
 0x33b   : > { %p1073_p3 = pnand %p1080_p10, %p1871_p1 }
 0x33d   : > { %1341 = dma.done.wait (!%p1073_p3), %s867_s10, 64  }
 0x33e   : > { %1343 = vsyncadd (!%p1073_p3), %s867_s10, 4294967232  ;;  %s876_s12 = scalar_lea.sflag [#allocation13], %s866_s11 }
 0x33f   : > { %1345 = dma.done.wait (!%p1073_p3), %s876_s12, 32  }
 0x340   : > { %1347 = vsyncadd (!%p1073_p3), %s876_s12, 4294967264  ;;  %s32_s26 = sadd.s32 1, %s1398_s26   ;;  %s1873_s8 = sld [smem:[#allocation17_spill]] }
 0x341   : > { %p1773_p8 = scmp.ge.s32.totalorder %s32_s26, 10   ;;  %s1874_s21 = sld [smem:[#allocation18_spill]] }
 0x342   : > { %s1875_s23 = sld [smem:[#allocation19_spill]]  ;;  %s1876_s3 = sld [smem:[#allocation20_spill]] }
 0x343   : > { %s1877_s4 = sld [smem:[#allocation21_spill]]  ;;  %s1878_s15 = smov %s1354_s16 }
 0x344   : > { %s1879_s16 = smov %s1358_s17  ;;  %s1880_s17 = smov %s1582_s24 }
 0x345   : > { %s1881_s18 = smov %s1366_s19  ;;  %s1882_s19 = smov %s1370_s20 }
 0x346   : > { %s1883_s20 = smov %s1579_s2  ;;  %s1884_s22 = smov %s1394_s25 }
 0x347   :  { %31 = sbr.rel (!%p1773_p8) target bundleno = 22 (0x16), region = 141 }
 0x348   : > { %s1885_s24 = smov %s1876_s3 }
 0x349   : > { %s1886_s25 = smov %s1877_s4 }
 0x34e   :  { %881 = vsyncpa [#allocation9], 1 }
 0x34f   :  { %883 = vsyncpa [#allocation9 + $0x1], 1 }
 0x350   :  { %884 = vsyncpa [#allocation10], 1 }
 0x351   :  { %886 = vsyncpa [#allocation10 + $0x1], 1 }
 0x352   :  { %887 = vsyncpa [#allocation13], 1 }
 0x353   :  { %889 = vsyncpa [#allocation13 + $0x1], 1 }

</bundles_post_ra>
